<compile_context>
chip_gen: v7x
topology: tpu7x:2x2x1
jax: 0.10.0
libtpu: 0.0.40
codegen_flags: <defaults>
</compile_context>

<pallas_src>
import math
from functools import partial

import jax
import jax.numpy as jnp
from jax.experimental import pallas as pl
from jax.experimental.pallas import tpu as pltpu


def _mha_kernel(*refs, n_head: int, head_size: int, has_mask: bool,
                approx_recip: bool, exp_in_bf16: bool):
    if has_mask:
        (q_ref, k_ref, v_ref, wq_ref, wk_ref, wv_ref,
         wfc_ref, bfc_ref, mask_ref, o_ref, acc_ref) = refs
    else:
        (q_ref, k_ref, v_ref, wq_ref, wk_ref, wv_ref,
         wfc_ref, bfc_ref, o_ref, acc_ref) = refs
        mask_ref = None

    # Per grid step (one batch element, one query tile):
    #   q_ref               : (1, Tq, C)      compute dtype
    #   k_ref / v_ref       : (1, T,  C)      resident per batch element
    #   wq_ref/wk_ref/wv_ref: (C, H*hs)       resident (scale folded into wq)
    #   wfc_ref             : (H*hs, d_out)   resident
    #   bfc_ref             : (1, d_out)      f32
    #   mask_ref (optional) : (Tq, T)         f32 additive (-inf where masked)
    #   o_ref               : (1, Tq, d_out)  f32
    #   acc_ref (scratch)   : (Tq, H*hs)      f32, lane-dense head-output slab
    cdtype = q_ref.dtype

    q = q_ref[0]            # (Tq, C)
    k = k_ref[0]            # (T,  C)
    v = v_ref[0]            # (T,  C)

    # Fused, lane-dense projections for ALL heads in one MXU pass each.
    qh = jnp.dot(q, wq_ref[...], preferred_element_type=jnp.float32).astype(cdtype)  # (Tq, H*hs)
    kh = jnp.dot(k, wk_ref[...], preferred_element_type=jnp.float32).astype(cdtype)  # (T,  H*hs)
    vh = jnp.dot(v, wv_ref[...], preferred_element_type=jnp.float32).astype(cdtype)  # (T,  H*hs)

    # One amortized XLU transpose instead of H per-head relayouts; per-head K
    # slices below are 8-aligned sublane slices.
    khT = kh.T                                                      # (H*hs, T)

    for h in range(n_head):                     # static trace-time loop
        lo = h * head_size
        qh_h = qh[:, lo:lo + head_size]                             # (Tq, hs)
        khT_h = khT[lo:lo + head_size, :]                           # (hs, T)  sublane slice
        vh_h = vh[:, lo:lo + head_size]                             # (T,  hs)

        # Scores are already scaled by 1/sqrt(hs) via the folded Wq.
        att = jnp.dot(qh_h, khT_h, preferred_element_type=jnp.float32)   # (Tq, T) f32
        if mask_ref is not None:
            att = att + mask_ref[...]           # module: attention[~mask] = -inf

        # Row-stabilized softmax; normalization deferred past the PV matmul.
        att_max = jnp.max(att, axis=-1, keepdims=True)
        z = att - att_max
        if exp_in_bf16:
            z = z.astype(jnp.bfloat16)          # bf16 EUP on v6e/v7x; harmless on v5e
        p = jnp.exp(z)                                              # un-normalized
        denom = jnp.sum(p, axis=-1, keepdims=True, dtype=jnp.float32)    # (Tq, 1) f32

        pv = jnp.dot(p.astype(cdtype), vh_h,
                     preferred_element_type=jnp.float32)            # (Tq, hs) f32

        if approx_recip:
            inv = pl.reciprocal(denom, approx=True)   # bf16 fast path only
        else:
            inv = 1.0 / denom                         # exact: matches torch.softmax
        # Lane-dense write of this head's slab; replaces list + jnp.concatenate.
        acc_ref[:, lo:lo + head_size] = pv * inv

    # "concat over heads, then fc" -> one lane-dense GEMM + single output store.
    cat = acc_ref[...].astype(cdtype)                               # (Tq, H*hs)
    out = jnp.dot(cat, wfc_ref[...], preferred_element_type=jnp.float32)  # (Tq, d_out)
    o_ref[0] = (out + bfc_ref[...]).astype(o_ref.dtype)


def multi_head_attention(q, k, v, wq, wk, wv, w_fc, b_fc, attn_mask=None,
                         *, compute_dtype=jnp.float32, q_tile=None):
    """q,k,v: (B,T,C) f32; wq/wk/wv: (H,C,hs); w_fc: (H*hs, d_out); b_fc: (d_out,).

    attn_mask: optional (T,T) bool — True = keep, False = mask to -inf (module
    semantics).  compute_dtype selects MXU operand dtype: f32 keeps exact module
    semantics, bf16 trades accuracy for ~2x MXU throughput (f32 accumulation).
    """
    B, T, C = q.shape
    H, _, hs = wq.shape
    d_out = w_fc.shape[1]
    is_bf16 = jnp.dtype(compute_dtype) == jnp.dtype(jnp.bfloat16)

    # Stack per-head projection weights lane-dense: (H, C, hs) -> (C, H*hs);
    # column block h*hs:(h+1)*hs == w[h] (matches concat-over-heads ordering).
    def stack(w, scale=None):
        w2 = jnp.transpose(w, (1, 0, 2)).reshape(C, H * hs)
        if scale is not None:
            w2 = w2 * scale                     # fold in f32, before the cast
        return w2.astype(compute_dtype)

    # Fold 1/sqrt(head_size) into Wq -> no per-element scale multiply in-kernel.
    wq_s = stack(wq, 1.0 / math.sqrt(float(hs)))
    wk_s = stack(wk)
    wv_s = stack(wv)
    # TODO(synk): when q is k is v (DETR encoder self-attention), concatenate
    # wq_s/wk_s/wv_s into one (C, 3*H*hs) operand and run a single projection GEMM.
    w_fc_c = w_fc.astype(compute_dtype)                 # (H*hs, d_out)
    b_fc_2d = b_fc.reshape(1, d_out).astype(jnp.float32)

    q_c = q.astype(compute_dtype)
    k_c = k.astype(compute_dtype)
    v_c = v.astype(compute_dtype)

    # Query tile: bounds the (Tq, T) f32 score tile in VMEM; prefer a divisor of T.
    if q_tile is None:
        if T <= 512:
            Tq = T
        else:
            Tq = next((t for t in (512, 448, 384, 320, 256, 128) if T % t == 0), 512)
    else:
        Tq = q_tile
    nq = pl.cdiv(T, Tq)

    has_mask = attn_mask is not None
    inputs = [q_c, k_c, v_c, wq_s, wk_s, wv_s, w_fc_c, b_fc_2d]
    in_specs = [
        pl.BlockSpec((1, Tq, C), lambda b, i: (b, i, 0)),      # q : Tq-blocked
        pl.BlockSpec((1, T, C), lambda b, i: (b, 0, 0)),       # k : resident per batch elem
        pl.BlockSpec((1, T, C), lambda b, i: (b, 0, 0)),       # v : resident per batch elem
        pl.BlockSpec((C, H * hs), lambda b, i: (0, 0)),        # wq (scale folded)
        pl.BlockSpec((C, H * hs), lambda b, i: (0, 0)),        # wk
        pl.BlockSpec((C, H * hs), lambda b, i: (0, 0)),        # wv
        pl.BlockSpec((H * hs, d_out), lambda b, i: (0, 0)),    # w_fc
        pl.BlockSpec((1, d_out), lambda b, i: (0, 0)),         # b_fc
    ]
    if has_mask:
        # Module: attention[:, ~mask] = -inf before softmax (2D mask broadcast over B).
        add_mask = jnp.where(attn_mask[:T, :T], 0.0, -jnp.inf).astype(jnp.float32)
        inputs.append(add_mask)
        in_specs.append(pl.BlockSpec((Tq, T), lambda b, i: (i, 0)))

    out_spec = pl.BlockSpec((1, Tq, d_out), lambda b, i: (b, i, 0))

    kernel = partial(_mha_kernel, n_head=H, head_size=hs, has_mask=has_mask,
                     approx_recip=is_bf16, exp_in_bf16=is_bf16)

    # VMEM budget from the real per-step footprint (double-buffered I/O, resident
    # weights, f32 intermediates, head-output scratch), clamped to 64 MiB so the
    # request is legal on every chip (v7x physical VMEM is 64 MiB per TC).
    bc = jnp.dtype(compute_dtype).itemsize
    est = (2 * Tq * C * bc                      # q (double-buffered)
           + 2 * 2 * T * C * bc                 # k, v
           + 2 * 3 * C * H * hs * bc            # wq/wk/wv
           + 2 * H * hs * d_out * bc + 2 * d_out * 4   # w_fc, b_fc
           + 2 * Tq * d_out * 4                 # output
           + Tq * H * hs * 4                    # scratch slab
           + (Tq + 3 * T) * H * hs * 4          # qh/kh/khT/vh intermediates
           + 3 * Tq * T * 4                     # att / p / temporaries
           + (2 * Tq * T * 4 if has_mask else 0))
    vmem_limit = int(min(64 * 1024 * 1024, max(32 * 1024 * 1024, est * 3 // 2)))

    return pl.pallas_call(
        kernel,
        out_shape=jax.ShapeDtypeStruct((B, T, d_out), jnp.float32),
        grid_spec=pltpu.PrefetchScalarGridSpec(
            num_scalar_prefetch=0,
            grid=(B, nq),
            in_specs=in_specs,
            out_specs=out_spec,
            scratch_shapes=[pltpu.VMEM((Tq, H * hs), jnp.float32)],
        ),
        compiler_params=pltpu.CompilerParams(
            dimension_semantics=("parallel", "parallel"),
            vmem_limit_bytes=vmem_limit),
    )(*inputs)


def _reference(q, k, v, wq, wk, wv, w_fc, b_fc, attn_mask=None):
    H, C, hs = wq.shape
    outs = []
    for h in range(H):
        qh = q @ wq[h]
        kh = k @ wk[h]
        vh = v @ wv[h]
        att = jnp.einsum("btd,bsd->bts", qh, kh)
        if attn_mask is not None:
            att = jnp.where(attn_mask[None, :, :], att, -jnp.inf)
        p = jax.nn.softmax(att / math.sqrt(hs), axis=-1)
        outs.append(jnp.einsum("bts,bsd->btd", p, vh))
    cat = jnp.concatenate(outs, axis=-1)
    return cat @ w_fc + b_fc


if __name__ == "__main__":
    # Small config consistent with the module: d_model=32, n_head=4, head_size=8,
    # batch=2, seq=8.
    B, T, d_model, n_head, head_size = 2, 8, 32, 4, 8

    key = jax.random.PRNGKey(0)
    k_q, k_k, k_v, k_wq, k_wk, k_wv, k_fc, k_bfc = jax.random.split(key, 8)

    q = jax.random.normal(k_q, (B, T, d_model), jnp.float32)
    k = jax.random.normal(k_k, (B, T, d_model), jnp.float32)
    v = jax.random.normal(k_v, (B, T, d_model), jnp.float32)

    # Deterministic parameter init (synthetic; shapes follow nn.Linear in the module).
    scale_proj = 1.0 / math.sqrt(d_model)
    wq = jax.random.uniform(k_wq, (n_head, d_model, head_size), jnp.float32,
                            -scale_proj, scale_proj)
    wk = jax.random.uniform(k_wk, (n_head, d_model, head_size), jnp.float32,
                            -scale_proj, scale_proj)
    wv = jax.random.uniform(k_wv, (n_head, d_model, head_size), jnp.float32,
                            -scale_proj, scale_proj)
    scale_fc = 1.0 / math.sqrt(n_head * head_size)
    w_fc = jax.random.uniform(k_fc, (n_head * head_size, d_model), jnp.float32,
                              -scale_fc, scale_fc)
    b_fc = jax.random.uniform(k_bfc, (d_model,), jnp.float32, -scale_fc, scale_fc)

    # 1) Exact-semantics path (f32 operands, exact softmax division).
    ref = _reference(q, k, v, wq, wk, wv, w_fc, b_fc)
    out_f32 = multi_head_attention(q, k, v, wq, wk, wv, w_fc, b_fc,
                                   compute_dtype=jnp.float32)
    out_f32 = jax.block_until_ready(out_f32)
    assert out_f32.shape == (B, T, d_model)
    assert jnp.allclose(out_f32, ref, atol=1e-4, rtol=1e-4), "f32 mismatch vs reference"

    # 2) Fast path (bf16 MXU operands, bf16 exp, approx reciprocal) -- looser tolerance.
    out_bf16 = multi_head_attention(q, k, v, wq, wk, wv, w_fc, b_fc,
                                    compute_dtype=jnp.bfloat16)
    out_bf16 = jax.block_until_ready(out_bf16)
    assert jnp.allclose(out_bf16, ref, atol=5e-2, rtol=5e-2), "bf16 mismatch vs reference"

    # 3) attn_mask path (module: attention[:, ~mask] = -inf), f32 operands.
    row = jnp.arange(T)[:, None]
    col = jnp.arange(T)[None, :]
    attn_mask = (col <= row) | (col == T - 1)          # every row keeps >=1 key
    ref_m = _reference(q, k, v, wq, wk, wv, w_fc, b_fc, attn_mask=attn_mask)
    out_m = multi_head_attention(q, k, v, wq, wk, wv, w_fc, b_fc, attn_mask=attn_mask,
                                 compute_dtype=jnp.float32)
    out_m = jax.block_until_ready(out_m)
    assert jnp.allclose(out_m, ref_m, atol=1e-4, rtol=1e-4), "masked mismatch vs reference"

    print("KERNEL_OK")
</pallas_src>

<mosaic_0001>
module attributes {stable_mosaic.version = 11 : i64} {
  func.func @_mha_kernel(%arg0: i32, %arg1: i32, %arg2: memref<1x8x32xf32, #tpu.memory_space<vmem>>, %arg3: memref<1x8x32xf32, #tpu.memory_space<vmem>>, %arg4: memref<1x8x32xf32, #tpu.memory_space<vmem>>, %arg5: memref<32x32xf32, #tpu.memory_space<vmem>>, %arg6: memref<32x32xf32, #tpu.memory_space<vmem>>, %arg7: memref<32x32xf32, #tpu.memory_space<vmem>>, %arg8: memref<32x32xf32, #tpu.memory_space<vmem>>, %arg9: memref<1x32xf32, #tpu.memory_space<vmem>>, %arg10: memref<1x8x32xf32, #tpu.memory_space<vmem>>, %arg11: memref<8x32xf32, #tpu.memory_space<vmem>>) attributes {dimension_semantics = [#tpu.dimension_semantics<parallel>, #tpu.dimension_semantics<parallel>], iteration_bounds = array<i64: 2, 1>, scalar_prefetch = 0 : i64, scratch_operands = 1 : i64, tpu.core_type = #tpu.core_type<tc>, window_params = [{transform_indices = @transform_0, window_bounds = array<i64: 1, 8, 32>}, {transform_indices = @transform_1, window_bounds = array<i64: 1, 8, 32>}, {transform_indices = @transform_2, window_bounds = array<i64: 1, 8, 32>}, {pipeline_mode = #tpu.pipeline_mode<synchronous>, transform_indices = @transform_3, window_bounds = array<i64: 32, 32>}, {pipeline_mode = #tpu.pipeline_mode<synchronous>, transform_indices = @transform_4, window_bounds = array<i64: 32, 32>}, {pipeline_mode = #tpu.pipeline_mode<synchronous>, transform_indices = @transform_5, window_bounds = array<i64: 32, 32>}, {pipeline_mode = #tpu.pipeline_mode<synchronous>, transform_indices = @transform_6, window_bounds = array<i64: 32, 32>}, {pipeline_mode = #tpu.pipeline_mode<synchronous>, transform_indices = @transform_7, window_bounds = array<i64: 1, 32>}, {transform_indices = @transform_8, window_bounds = array<i64: 1, 8, 32>}]} {
    %c0 = arith.constant 0 : index
    %c0_0 = arith.constant 0 : index
    %c0_1 = arith.constant 0 : index
    %0 = vector.load %arg2[%c0, %c0_0, %c0_1] : memref<1x8x32xf32, #tpu.memory_space<vmem>>, vector<1x8x32xf32>
    %1 = vector.shape_cast %0 : vector<1x8x32xf32> to vector<8x32xf32>
    %c0_2 = arith.constant 0 : index
    %c0_3 = arith.constant 0 : index
    %c0_4 = arith.constant 0 : index
    %2 = vector.load %arg3[%c0_2, %c0_3, %c0_4] : memref<1x8x32xf32, #tpu.memory_space<vmem>>, vector<1x8x32xf32>
    %3 = vector.shape_cast %2 : vector<1x8x32xf32> to vector<8x32xf32>
    %c0_5 = arith.constant 0 : index
    %c0_6 = arith.constant 0 : index
    %c0_7 = arith.constant 0 : index
    %4 = vector.load %arg4[%c0_5, %c0_6, %c0_7] : memref<1x8x32xf32, #tpu.memory_space<vmem>>, vector<1x8x32xf32>
    %5 = vector.shape_cast %4 : vector<1x8x32xf32> to vector<8x32xf32>
    %c0_8 = arith.constant 0 : index
    %c0_9 = arith.constant 0 : index
    %6 = vector.load %arg5[%c0_8, %c0_9] : memref<32x32xf32, #tpu.memory_space<vmem>>, vector<32x32xf32>
    %cst = arith.constant dense<0.000000e+00> : vector<8x32xf32>
    %7 = tpu.matmul %1, %6, %cst {dimension_numbers = #tpu.dot_dimension_numbers<[1], [0], [0], [1], [0, 0, 1, 1], [], []>} : vector<8x32xf32>, vector<32x32xf32>, vector<8x32xf32> -> vector<8x32xf32>
    %c0_10 = arith.constant 0 : index
    %c0_11 = arith.constant 0 : index
    %8 = vector.load %arg6[%c0_10, %c0_11] : memref<32x32xf32, #tpu.memory_space<vmem>>, vector<32x32xf32>
    %cst_12 = arith.constant dense<0.000000e+00> : vector<8x32xf32>
    %9 = tpu.matmul %3, %8, %cst_12 {dimension_numbers = #tpu.dot_dimension_numbers<[1], [0], [0], [1], [0, 0, 1, 1], [], []>} : vector<8x32xf32>, vector<32x32xf32>, vector<8x32xf32> -> vector<8x32xf32>
    %c0_13 = arith.constant 0 : index
    %c0_14 = arith.constant 0 : index
    %10 = vector.load %arg7[%c0_13, %c0_14] : memref<32x32xf32, #tpu.memory_space<vmem>>, vector<32x32xf32>
    %cst_15 = arith.constant dense<0.000000e+00> : vector<8x32xf32>
    %11 = tpu.matmul %5, %10, %cst_15 {dimension_numbers = #tpu.dot_dimension_numbers<[1], [0], [0], [1], [0, 0, 1, 1], [], []>} : vector<8x32xf32>, vector<32x32xf32>, vector<8x32xf32> -> vector<8x32xf32>
    %12 = tpu.transpose %9, [1, 0] : vector<8x32xf32> -> vector<32x8xf32>
    %13 = vector.extract_strided_slice %7 {offsets = [0, 0], sizes = [8, 8], strides = [1, 1]} : vector<8x32xf32> to vector<8x8xf32>
    %14 = vector.extract_strided_slice %12 {offsets = [0, 0], sizes = [8, 8], strides = [1, 1]} : vector<32x8xf32> to vector<8x8xf32>
    %15 = vector.extract_strided_slice %11 {offsets = [0, 0], sizes = [8, 8], strides = [1, 1]} : vector<8x32xf32> to vector<8x8xf32>
    %cst_16 = arith.constant dense<0.000000e+00> : vector<8x8xf32>
    %16 = tpu.matmul %13, %14, %cst_16 {dimension_numbers = #tpu.dot_dimension_numbers<[1], [0], [0], [1], [0, 0, 1, 1], [], []>} : vector<8x8xf32>, vector<8x8xf32>, vector<8x8xf32> -> vector<8x8xf32>
    %cst_17 = arith.constant dense<0xFF800000> : vector<8xf32>
    %17 = vector.multi_reduction <maximumf>, %16, %cst_17 [1] : vector<8x8xf32> to vector<8xf32>
    %18 = vector.shape_cast %17 : vector<8xf32> to vector<8x1xf32>
    %19 = vector.broadcast %18 : vector<8x1xf32> to vector<8x8xf32>
    %20 = arith.subf %16, %19 : vector<8x8xf32>
    %21 = math.exp %20 : vector<8x8xf32>
    %cst_18 = arith.constant dense<0.000000e+00> : vector<8xf32>
    %22 = vector.multi_reduction <add>, %21, %cst_18 [1] : vector<8x8xf32> to vector<8xf32>
    %23 = vector.shape_cast %22 : vector<8xf32> to vector<8x1xf32>
    %cst_19 = arith.constant dense<0.000000e+00> : vector<8x8xf32>
    %24 = tpu.matmul %21, %15, %cst_19 {dimension_numbers = #tpu.dot_dimension_numbers<[1], [0], [0], [1], [0, 0, 1, 1], [], []>} : vector<8x8xf32>, vector<8x8xf32>, vector<8x8xf32> -> vector<8x8xf32>
    %cst_20 = arith.constant 1.000000e+00 : f32
    %25 = vector.broadcast %cst_20 : f32 to vector<8x1xf32>
    %26 = arith.divf %25, %23 : vector<8x1xf32>
    %27 = vector.broadcast %26 : vector<8x1xf32> to vector<8x8xf32>
    %28 = arith.mulf %24, %27 : vector<8x8xf32>
    %c0_21 = arith.constant 0 : index
    %c0_22 = arith.constant 0 : index
    %29 = vector.load %arg11[%c0_21, %c0_22] : memref<8x32xf32, #tpu.memory_space<vmem>>, vector<8x8xf32>
    tpu.vector_store %arg11[%c0_21, %c0_22], %28 {strides = array<i32>} : memref<8x32xf32, #tpu.memory_space<vmem>>, vector<8x8xf32>,
    %30 = vector.extract_strided_slice %7 {offsets = [0, 8], sizes = [8, 8], strides = [1, 1]} : vector<8x32xf32> to vector<8x8xf32>
    %31 = vector.extract_strided_slice %12 {offsets = [8, 0], sizes = [8, 8], strides = [1, 1]} : vector<32x8xf32> to vector<8x8xf32>
    %32 = vector.extract_strided_slice %11 {offsets = [0, 8], sizes = [8, 8], strides = [1, 1]} : vector<8x32xf32> to vector<8x8xf32>
    %cst_23 = arith.constant dense<0.000000e+00> : vector<8x8xf32>
    %33 = tpu.matmul %30, %31, %cst_23 {dimension_numbers = #tpu.dot_dimension_numbers<[1], [0], [0], [1], [0, 0, 1, 1], [], []>} : vector<8x8xf32>, vector<8x8xf32>, vector<8x8xf32> -> vector<8x8xf32>
    %cst_24 = arith.constant dense<0xFF800000> : vector<8xf32>
    %34 = vector.multi_reduction <maximumf>, %33, %cst_24 [1] : vector<8x8xf32> to vector<8xf32>
    %35 = vector.shape_cast %34 : vector<8xf32> to vector<8x1xf32>
    %36 = vector.broadcast %35 : vector<8x1xf32> to vector<8x8xf32>
    %37 = arith.subf %33, %36 : vector<8x8xf32>
    %38 = math.exp %37 : vector<8x8xf32>
    %cst_25 = arith.constant dense<0.000000e+00> : vector<8xf32>
    %39 = vector.multi_reduction <add>, %38, %cst_25 [1] : vector<8x8xf32> to vector<8xf32>
    %40 = vector.shape_cast %39 : vector<8xf32> to vector<8x1xf32>
    %cst_26 = arith.constant dense<0.000000e+00> : vector<8x8xf32>
    %41 = tpu.matmul %38, %32, %cst_26 {dimension_numbers = #tpu.dot_dimension_numbers<[1], [0], [0], [1], [0, 0, 1, 1], [], []>} : vector<8x8xf32>, vector<8x8xf32>, vector<8x8xf32> -> vector<8x8xf32>
    %cst_27 = arith.constant 1.000000e+00 : f32
    %42 = vector.broadcast %cst_27 : f32 to vector<8x1xf32>
    %43 = arith.divf %42, %40 : vector<8x1xf32>
    %44 = vector.broadcast %43 : vector<8x1xf32> to vector<8x8xf32>
    %45 = arith.mulf %41, %44 : vector<8x8xf32>
    %c0_28 = arith.constant 0 : index
    %c8 = arith.constant 8 : index
    %46 = vector.load %arg11[%c0_28, %c8] : memref<8x32xf32, #tpu.memory_space<vmem>>, vector<8x8xf32>
    tpu.vector_store %arg11[%c0_28, %c8], %45 {strides = array<i32>} : memref<8x32xf32, #tpu.memory_space<vmem>>, vector<8x8xf32>,
    %47 = vector.extract_strided_slice %7 {offsets = [0, 16], sizes = [8, 8], strides = [1, 1]} : vector<8x32xf32> to vector<8x8xf32>
    %48 = vector.extract_strided_slice %12 {offsets = [16, 0], sizes = [8, 8], strides = [1, 1]} : vector<32x8xf32> to vector<8x8xf32>
    %49 = vector.extract_strided_slice %11 {offsets = [0, 16], sizes = [8, 8], strides = [1, 1]} : vector<8x32xf32> to vector<8x8xf32>
    %cst_29 = arith.constant dense<0.000000e+00> : vector<8x8xf32>
    %50 = tpu.matmul %47, %48, %cst_29 {dimension_numbers = #tpu.dot_dimension_numbers<[1], [0], [0], [1], [0, 0, 1, 1], [], []>} : vector<8x8xf32>, vector<8x8xf32>, vector<8x8xf32> -> vector<8x8xf32>
    %cst_30 = arith.constant dense<0xFF800000> : vector<8xf32>
    %51 = vector.multi_reduction <maximumf>, %50, %cst_30 [1] : vector<8x8xf32> to vector<8xf32>
    %52 = vector.shape_cast %51 : vector<8xf32> to vector<8x1xf32>
    %53 = vector.broadcast %52 : vector<8x1xf32> to vector<8x8xf32>
    %54 = arith.subf %50, %53 : vector<8x8xf32>
    %55 = math.exp %54 : vector<8x8xf32>
    %cst_31 = arith.constant dense<0.000000e+00> : vector<8xf32>
    %56 = vector.multi_reduction <add>, %55, %cst_31 [1] : vector<8x8xf32> to vector<8xf32>
    %57 = vector.shape_cast %56 : vector<8xf32> to vector<8x1xf32>
    %cst_32 = arith.constant dense<0.000000e+00> : vector<8x8xf32>
    %58 = tpu.matmul %55, %49, %cst_32 {dimension_numbers = #tpu.dot_dimension_numbers<[1], [0], [0], [1], [0, 0, 1, 1], [], []>} : vector<8x8xf32>, vector<8x8xf32>, vector<8x8xf32> -> vector<8x8xf32>
    %cst_33 = arith.constant 1.000000e+00 : f32
    %59 = vector.broadcast %cst_33 : f32 to vector<8x1xf32>
    %60 = arith.divf %59, %57 : vector<8x1xf32>
    %61 = vector.broadcast %60 : vector<8x1xf32> to vector<8x8xf32>
    %62 = arith.mulf %58, %61 : vector<8x8xf32>
    %c0_34 = arith.constant 0 : index
    %c16 = arith.constant 16 : index
    %63 = vector.load %arg11[%c0_34, %c16] : memref<8x32xf32, #tpu.memory_space<vmem>>, vector<8x8xf32>
    tpu.vector_store %arg11[%c0_34, %c16], %62 {strides = array<i32>} : memref<8x32xf32, #tpu.memory_space<vmem>>, vector<8x8xf32>,
    %64 = vector.extract_strided_slice %7 {offsets = [0, 24], sizes = [8, 8], strides = [1, 1]} : vector<8x32xf32> to vector<8x8xf32>
    %65 = vector.extract_strided_slice %12 {offsets = [24, 0], sizes = [8, 8], strides = [1, 1]} : vector<32x8xf32> to vector<8x8xf32>
    %66 = vector.extract_strided_slice %11 {offsets = [0, 24], sizes = [8, 8], strides = [1, 1]} : vector<8x32xf32> to vector<8x8xf32>
    %cst_35 = arith.constant dense<0.000000e+00> : vector<8x8xf32>
    %67 = tpu.matmul %64, %65, %cst_35 {dimension_numbers = #tpu.dot_dimension_numbers<[1], [0], [0], [1], [0, 0, 1, 1], [], []>} : vector<8x8xf32>, vector<8x8xf32>, vector<8x8xf32> -> vector<8x8xf32>
    %cst_36 = arith.constant dense<0xFF800000> : vector<8xf32>
    %68 = vector.multi_reduction <maximumf>, %67, %cst_36 [1] : vector<8x8xf32> to vector<8xf32>
    %69 = vector.shape_cast %68 : vector<8xf32> to vector<8x1xf32>
    %70 = vector.broadcast %69 : vector<8x1xf32> to vector<8x8xf32>
    %71 = arith.subf %67, %70 : vector<8x8xf32>
    %72 = math.exp %71 : vector<8x8xf32>
    %cst_37 = arith.constant dense<0.000000e+00> : vector<8xf32>
    %73 = vector.multi_reduction <add>, %72, %cst_37 [1] : vector<8x8xf32> to vector<8xf32>
    %74 = vector.shape_cast %73 : vector<8xf32> to vector<8x1xf32>
    %cst_38 = arith.constant dense<0.000000e+00> : vector<8x8xf32>
    %75 = tpu.matmul %72, %66, %cst_38 {dimension_numbers = #tpu.dot_dimension_numbers<[1], [0], [0], [1], [0, 0, 1, 1], [], []>} : vector<8x8xf32>, vector<8x8xf32>, vector<8x8xf32> -> vector<8x8xf32>
    %cst_39 = arith.constant 1.000000e+00 : f32
    %76 = vector.broadcast %cst_39 : f32 to vector<8x1xf32>
    %77 = arith.divf %76, %74 : vector<8x1xf32>
    %78 = vector.broadcast %77 : vector<8x1xf32> to vector<8x8xf32>
    %79 = arith.mulf %75, %78 : vector<8x8xf32>
    %c0_40 = arith.constant 0 : index
    %c24 = arith.constant 24 : index
    %80 = vector.load %arg11[%c0_40, %c24] : memref<8x32xf32, #tpu.memory_space<vmem>>, vector<8x8xf32>
    tpu.vector_store %arg11[%c0_40, %c24], %79 {strides = array<i32>} : memref<8x32xf32, #tpu.memory_space<vmem>>, vector<8x8xf32>,
    %c0_41 = arith.constant 0 : index
    %c0_42 = arith.constant 0 : index
    %81 = vector.load %arg11[%c0_41, %c0_42] : memref<8x32xf32, #tpu.memory_space<vmem>>, vector<8x32xf32>
    %c0_43 = arith.constant 0 : index
    %c0_44 = arith.constant 0 : index
    %82 = vector.load %arg8[%c0_43, %c0_44] : memref<32x32xf32, #tpu.memory_space<vmem>>, vector<32x32xf32>
    %cst_45 = arith.constant dense<0.000000e+00> : vector<8x32xf32>
    %83 = tpu.matmul %81, %82, %cst_45 {dimension_numbers = #tpu.dot_dimension_numbers<[1], [0], [0], [1], [0, 0, 1, 1], [], []>} : vector<8x32xf32>, vector<32x32xf32>, vector<8x32xf32> -> vector<8x32xf32>
    %c0_46 = arith.constant 0 : index
    %c0_47 = arith.constant 0 : index
    %84 = vector.load %arg9[%c0_46, %c0_47] : memref<1x32xf32, #tpu.memory_space<vmem>>, vector<1x32xf32>
    %85 = vector.broadcast %84 : vector<1x32xf32> to vector<8x32xf32>
    %86 = arith.addf %83, %85 : vector<8x32xf32>
    %c0_48 = arith.constant 0 : index
    %c0_49 = arith.constant 0 : index
    %c0_50 = arith.constant 0 : index
    %87 = vector.load %arg10[%c0_48, %c0_49, %c0_50] : memref<1x8x32xf32, #tpu.memory_space<vmem>>, vector<1x8x32xf32>
    %88 = vector.shape_cast %87 : vector<1x8x32xf32> to vector<8x32xf32>
    %89 = vector.shape_cast %86 : vector<8x32xf32> to vector<1x8x32xf32>
    tpu.vector_store %arg10[%c0_48, %c0_49, %c0_50], %89 {strides = array<i32>} : memref<1x8x32xf32, #tpu.memory_space<vmem>>, vector<1x8x32xf32>,
    return
  }
  func.func @transform_0(%arg0: i32, %arg1: i32) -> (i32, i32, i32) {
    %c0_i32 = arith.constant 0 : i32
    %c0_i32_0 = arith.constant 0 : i32
    return %arg0, %arg1, %c0_i32 : i32, i32, i32
  }
  func.func @transform_1(%arg0: i32, %arg1: i32) -> (i32, i32, i32) {
    %c0_i32 = arith.constant 0 : i32
    %c0_i32_0 = arith.constant 0 : i32
    %c0_i32_1 = arith.constant 0 : i32
    return %arg0, %c0_i32, %c0_i32_0 : i32, i32, i32
  }
  func.func @transform_2(%arg0: i32, %arg1: i32) -> (i32, i32, i32) {
    %c0_i32 = arith.constant 0 : i32
    %c0_i32_0 = arith.constant 0 : i32
    %c0_i32_1 = arith.constant 0 : i32
    return %arg0, %c0_i32, %c0_i32_0 : i32, i32, i32
  }
  func.func @transform_3(%arg0: i32, %arg1: i32) -> (i32, i32) {
    %c0_i32 = arith.constant 0 : i32
    %c0_i32_0 = arith.constant 0 : i32
    %c0_i32_1 = arith.constant 0 : i32
    return %c0_i32, %c0_i32_0 : i32, i32
  }
  func.func @transform_4(%arg0: i32, %arg1: i32) -> (i32, i32) {
    %c0_i32 = arith.constant 0 : i32
    %c0_i32_0 = arith.constant 0 : i32
    %c0_i32_1 = arith.constant 0 : i32
    return %c0_i32, %c0_i32_0 : i32, i32
  }
  func.func @transform_5(%arg0: i32, %arg1: i32) -> (i32, i32) {
    %c0_i32 = arith.constant 0 : i32
    %c0_i32_0 = arith.constant 0 : i32
    %c0_i32_1 = arith.constant 0 : i32
    return %c0_i32, %c0_i32_0 : i32, i32
  }
  func.func @transform_6(%arg0: i32, %arg1: i32) -> (i32, i32) {
    %c0_i32 = arith.constant 0 : i32
    %c0_i32_0 = arith.constant 0 : i32
    %c0_i32_1 = arith.constant 0 : i32
    return %c0_i32, %c0_i32_0 : i32, i32
  }
  func.func @transform_7(%arg0: i32, %arg1: i32) -> (i32, i32) {
    %c0_i32 = arith.constant 0 : i32
    %c0_i32_0 = arith.constant 0 : i32
    %c0_i32_1 = arith.constant 0 : i32
    return %c0_i32, %c0_i32_0 : i32, i32
  }
  func.func @transform_8(%arg0: i32, %arg1: i32) -> (i32, i32, i32) {
    %c0_i32 = arith.constant 0 : i32
    %c0_i32_0 = arith.constant 0 : i32
    return %arg0, %arg1, %c0_i32 : i32, i32, i32
  }
}

</mosaic_0001>

<bundles_post_ra>
// kernel: tpu_custom_call.1
= control target key start
LH: loop header
LB: loop body
LE: loop exit
PB: predicated region body
PF: predicated region fallthrough
CT: control target
= control target key end

     0   :  { %s2797_s0 = inlined_call_operand.hbm [shape: f32[2,8,32], index: 0, kind: input, shape index: {}]   ;;  %s2798_s1 = inlined_call_operand.hbm [shape: f32[2,8,32], index: 1, kind: input, shape index: {}]   ;;  %s2799_s2 = inlined_call_operand.hbm [shape: f32[2,8,32], index: 2, kind: input, shape index: {}]   ;;  %s2800_s3 = inlined_call_operand.hbm [shape: f32[32,32], index: 3, kind: input, shape index: {}]   ;;  %s2801_s4 = inlined_call_operand.hbm [shape: f32[32,32], index: 4, kind: input, shape index: {}]   ;;  %s2802_s5 = inlined_call_operand.hbm [shape: f32[32,32], index: 5, kind: input, shape index: {}]   ;;  %s2803_s6 = inlined_call_operand.hbm [shape: f32[32,32], index: 6, kind: input, shape index: {}]   ;;  %s2804_s7 = inlined_call_operand.vmem [shape: f32[1,32], index: 7, kind: input, shape index: {}]   ;;  %s2805_s8 = inlined_call_operand.hbm [shape: f32[2,8,32], index: 8, kind: output, shape index: {}]  }
   0x1   :  { %2830 = sst [smem:[#allocation27_spill]] %s2798_s1 }
   0x2   :  { %2831 = sst [smem:[#allocation28_spill]] %s2800_s3 }
   0x3   :  { %2832 = sst [smem:[#allocation29_spill]] %s2802_s5 }
   0x4   :  { %2833 = sst [smem:[#allocation30_spill]] %s2804_s7 }
   0x5   :  { %2834 = sst [smem:[#allocation31_spill]] %s2805_s8 }
   0x6   :  { %13 = vsyncpa [#allocation4], 0 }
   0x7   :  { %15 = vsyncpa [#allocation4 + $0x1], 0 }
   0x8   :  { %16 = vsyncpa [#allocation7], 0 }
   0x9   :  { %18 = vsyncpa [#allocation7 + $0x1], 0 }
   0xa   :  { %19 = vsyncpa [#allocation10], 0 }
   0xb   :  { %20 = vsyncpa [#allocation13], 0 }
   0xc   :  { %21 = vsyncpa [#allocation5], 0 }
   0xd   :  { %23 = vsyncpa [#allocation5 + $0x1], 0  ;;  %s2334_s27 = smov 0   ;;  %s2336_s28 = smov 0  }
   0xe   :  { %s2338_s29 = smov 0   ;;  %s2340_s30 = smov 0  }
   0xf   :  { %s2342_s9 = smov 0   ;;  %s2344_s10 = smov 0  }
  0x10 LB: > { %2835 = sst [smem:[#allocation21_spill]] %s2248_s27  ;;  %s2365_s11 = sadd.s32 4294967295, %s2268_s10   ;;  %s2268_s10 = sphi %s2344_s10, %s29_s10   ;;  %s2264_s9 = sphi %s2342_s9, %s2877_s9   ;;  %s2260_s30 = sphi %s2340_s30, %s2876_s30   ;;  %s2256_s29 = sphi %s2338_s29, %s2880_s29   ;;  %s2252_s28 = sphi %s2336_s28, %s2879_s28   ;;  %s2248_s27 = sphi %s2334_s27, %s2878_s27  }
  0x11   : > { %2836 = sst [smem:[#allocation22_spill]] %s2264_s9  ;;  %p1646_p0 = scmp.ge.s32.totalorder %s2268_s10, 1 }
  0x12   : > { %2837 = sst [smem:[#allocation23_spill]] %s2268_s10  ;;  %p2816_p1 = scmp.eq.s32.totalorder %s2365_s11, 0 }
  0x13   : > { %p259_p2 = scmp.lt.s32.totalorder %s2268_s10, 3  ;;  %s2270_s13 = smov [#allocation9]  }
  0x14   : > { %s271_s14 = sshll.u32 %s2270_s13, 4  ;;  %s2271_s16 = smov [#allocation12]   ;;  %s2374_s14 = int_to_ptr.vmem [resolvable:$true] %s271_s14 }
  0x15   : > { %p2370_p3 = pnand %p1646_p0, %p259_p2  ;;  %s297_s17 = sshll.u32 %s2271_s16, 4  ;;  %s2385_s17 = int_to_ptr.vmem [resolvable:$true] %s297_s17 }
  0x16   : > { %s2840_s3 = sld [smem:[#allocation28_spill]] }
  0x17   : > { %s2838_s12 = scalar_select %p2370_p3, 1, 0 }
  0x18   : > { %p1856_p4 = pneg %p2370_p3 }
  0x1a   : > { %p2381_p6 = pnand %p1856_p4, %p2816_p1 }
  0x1c   : > { %s2839_s15 = scalar_select %p2381_p6, 1, 0 }
  0x1d   : > { %s1972_s20 = scalar_lea.hbm %s2840_s3, 512  ;;  %p2395_p8 = pneg %p2381_p6 }
  0x1e   : > { %p1973_p7 = scmp.ne.s32.totalorder %s2840_s3, %s1972_s20  ;;  %p1979_p11 = scmp.lt.u32.totalorder %s1972_s20, %s2840_s3 }
  0x1f   : > { %s2841_s23 = scalar_select %p2395_p8, 1, 0 }
  0x20   : > { %p1975_p9 = pnand %p2395_p8, %p1973_p7 }
  0x22   : > { %p1976_p10 = pneg %p1975_p9 }
  0x24   : > { %p1981_p12 = pnand %p1979_p11, %p1976_p10 }
  0x26   : > { %1984 = shalt.err (!%p1981_p12)
}
  0x27   : > { %s1985_s26 = scalar_lea.vmem %s2374_s14, 512  ;;  %p1993_p4 = scmp.lt.s32.totalorder %s2374_s14, %s2374_s14 }
  0x28   : > { %p1986_p13 = scmp.ne.s32.totalorder %s2374_s14, %s1985_s26  ;;  %p1994_p5 = scmp.lt.s32.totalorder %s1985_s26, %s1985_s26 }
  0x2a   : > { %p1988_p0 = pnand %p1986_p13, %p2395_p8  ;;  %p1995_p7 = por %p1994_p5, %p1993_p4 }
  0x2c   : > { %p1989_p2 = pneg %p1988_p0 }
  0x2e   : > { %p1996_p9 = pnand %p1995_p7, %p1989_p2 }
  0x30   : > { %1999 = shalt.err (!%p1996_p9)
}
  0x31   : > { %s2807_s13 = smov 128   ;;  %s2809_s16 = smov 8  }
  0x32   : > { %1859 = dma.hbm_to_vmem [thread:$0]  (!%p2381_p6), %s2840_s3, 512, %s2374_s14, [#allocation10], %s2807_s13, %s2807_s13, %s2809_s16  }
  0x33   : > { %s2842_s5 = sld [smem:[#allocation29_spill]] }
  0x39   : > { %s2000_s22 = scalar_lea.hbm %s2842_s5, 512 }
  0x3a   : > { %p2001_p5 = scmp.ne.s32.totalorder %s2842_s5, %s2000_s22  ;;  %p2007_p12 = scmp.lt.u32.totalorder %s2000_s22, %s2842_s5 }
  0x3c   : > { %p2003_p10 = pnand %p2001_p5, %p2395_p8 }
  0x3e   : > { %p2004_p11 = pneg %p2003_p10 }
  0x40   : > { %p2009_p13 = pnand %p2007_p12, %p2004_p11 }
  0x42   : > { %2012 = shalt.err (!%p2009_p13)
}
  0x43   : > { %s2013_s14 = scalar_lea.vmem %s2385_s17, 512  ;;  %p2021_p7 = scmp.lt.s32.totalorder %s2385_s17, %s2385_s17 }
  0x44   : > { %p2014_p0 = scmp.ne.s32.totalorder %s2385_s17, %s2013_s14  ;;  %p2022_p9 = scmp.lt.s32.totalorder %s2013_s14, %s2013_s14 }
  0x46   : > { %p2016_p2 = pnand %p2014_p0, %p2395_p8  ;;  %p2023_p5 = por %p2022_p9, %p2021_p7 }
  0x48   : > { %p2017_p4 = pneg %p2016_p2 }
  0x4a   : > { %p2024_p10 = pnand %p2023_p5, %p2017_p4 }
  0x4c   : > { %2027 = shalt.err (!%p2024_p10)
}
  0x4d   : > { %1865 = dma.hbm_to_vmem [thread:$0]  (!%p2381_p6), %s2842_s5, 512, %s2385_s17, [#allocation13], %s2807_s13, %s2807_s13, %s2809_s16  }
  0x4e   : > { %s1645_s19 = sadd.s32 4294967294, %s2268_s10   ;;  %s41_s20 = sadd.s32 1, %s2264_s9 }
  0x4f   : > { %p43_p11 = scmp.ge.s32.totalorder %s41_s20, 2  ;;  %s50_s21 = sadd.s32 1, %s2256_s29 }
  0x50   : > { %p57_p12 = scmp.ne.s32.totalorder %s2256_s29, %s2252_s28  ;;  %p58_p13 = scmp.eq.s32.totalorder %s2268_s10, 0 }
  0x51   : > { %s2882_s20 = smov (%p43_p11, %s41_s20), 0  ;;  %p63_p2 = scmp.ne.s32.totalorder %s2252_s28, %s2248_s27 }
  0x52   : > { %2843 = sst [smem:[#allocation24_spill]] %s2882_s20  ;;  %p2453_p0 = por %p58_p13, %p57_p12 }
  0x53   : > { %s45_s17 = ssub.s32 %s2264_s9, %s2882_s20  ;;  %p246_p4 = scmp.eq.s32.totalorder %s2365_s11, 1 }
  0x54   : > { %p48_p7 = scmp.eq.s32.totalorder %s45_s17, 0  ;;  %p2464_p9 = por %p2816_p1, %p63_p2 }
  0x55   : > { %p2468_p5 = por %p246_p4, %p57_p12  ;;  %p252_p10 = scmp.eq.s32.totalorder %s1645_s19, 1 }
  0x56   : > { %s2845_s24 = scalar_select %p2464_p9, 1, 0 }
  0x57   : > { %s2846_s25 = scalar_select %p2468_p5, 1, 0 }
  0x58   : > { %s2473_s26 = scalar_select %p48_p7, %s2256_s29, %s50_s21  }
  0x59   : > { %p2475_p11 = por %p252_p10, %p63_p2  ;;  %p1887_p13 = scmp.lt.s32.totalorder %s2268_s10, 2 }
  0x5a   : > { %2847 = sst [smem:[#allocation25_spill]] %s2473_s26  ;;  %s2811_s8 = sand.u32 1, %s2256_s29  }
  0x5b   : > { %s2848_s14 = scalar_select %p2475_p11, 1, 0 }
  0x5c   : > { %s2482_s18 = sshll.u32 %s2264_s9, 7  ;;  %s2486_s17 = sshll.u32 %s2811_s8, 3 }
  0x5d   : > { %2849 = sst [smem:[#allocation26_spill]] %s2848_s14  ;;  %p2490_p12 = pnand %p1887_p13, %p2453_p0 }
  0x5e   : > { %s346_s19 = sand.u32 1, %s2268_s10   ;;  %s2851_s1 = sld [smem:[#allocation27_spill]] }
  0x5f   : > { %s2850_s13 = scalar_select %p2490_p12, 1, 0 }
  0x60   : > { %s350_s5 = scalar_lea.vmem [#allocation6], %s2486_s17  ;;  %s2504_s22 = scalar_lea.sflag [#allocation7], %s346_s19 }
  0x61   : > { %s357_s8 = sshll.u32 %s350_s5, 4  ;;  %p2510_p2 = pneg %p2490_p12  ;;  %s2502_s8 = int_to_ptr.vmem [resolvable:$true] %s357_s8 }
  0x63   : > { %s2852_s9 = scalar_select %p2510_p2, 1, 0 }
  0x64   : > { %s2499_s3 = scalar_lea.hbm %s2851_s1, %s2482_s18  ;;  %s2033_s26 = scalar_lea.hbm %s2851_s1, 256 }
  0x65   : > { %s2028_s20 = scalar_lea.hbm %s2499_s3, 128  ;;  %p2034_p10 = scmp.lt.u32.totalorder %s2499_s3, %s2851_s1 }
  0x66   : > { %p2029_p0 = scmp.ne.s32.totalorder %s2499_s3, %s2028_s20  ;;  %p2035_p13 = scmp.lt.u32.totalorder %s2033_s26, %s2028_s20 }
  0x67   : > { %p2037_p11 = scmp.lt.u32.totalorder %s2028_s20, %s2499_s3 }
  0x68   : > { %p2031_p4 = pnand %p2510_p2, %p2029_p0  ;;  %p2036_p1 = por %p2035_p13, %p2034_p10 }
  0x6a   : > { %p2032_p7 = pneg %p2031_p4  ;;  %p2038_p5 = por %p2037_p11, %p2036_p1 }
  0x6c   : > { %p2039_p9 = pnand %p2038_p5, %p2032_p7 }
  0x6e   : > { %2042 = shalt.err (!%p2039_p9)
}
  0x6f   : > { %s2043_s19 = scalar_lea.vmem %s2502_s8, 128  ;;  %s2274_s16 = smov [#allocation6]  }
  0x70   : > { %p2044_p0 = scmp.ne.s32.totalorder %s2502_s8, %s2043_s19  ;;  %s2048_s21 = sshll.u32 %s2274_s16, 4  ;;  %s2049_s21 = int_to_ptr.vmem [resolvable:$false] %s2048_s21 }
  0x71   : > { %s2050_s10 = scalar_lea.vmem %s2049_s21, 256  ;;  %p2051_p6 = scmp.lt.s32.totalorder %s2502_s8, %s2049_s21 }
  0x72   : > { %p2046_p4 = pnand %p2044_p0, %p2510_p2  ;;  %p2052_p8 = scmp.lt.s32.totalorder %s2050_s10, %s2043_s19 }
  0x74   : > { %p2047_p3 = pneg %p2046_p4  ;;  %p2053_p10 = por %p2052_p8, %p2051_p6 }
  0x76   : > { %p2054_p13 = pnand %p2053_p10, %p2047_p3 }
  0x78   : > { %2057 = shalt.err (!%p2054_p13)
}
  0x79   : > { %1875 = dma.hbm_to_vmem [thread:$0]  (!%p2490_p12), %s2499_s3, 128, %s2502_s8, %s2504_s22  }
  0x7a   : > { %s2275_s20 = smov [#allocation11]   ;;  %s2276_s5 = smov [#allocation14]  }
  0x7b   : > { %s284_s26 = sshll.u32 %s2275_s20, 4  ;;  %s310_s1 = sshll.u32 %s2276_s5, 4  ;;  %s285_s26 = int_to_ptr.vmem [resolvable:$true] %s284_s26  ;;  %s311_s1 = int_to_ptr.vmem [resolvable:$true] %s310_s1 }
  0x7c   : > { %s2058_s21 = scalar_lea.hbm %s2801_s4, 512  ;;  %p2853_p3 = scmp.ne.s32.totalorder %s2841_s23, 0 }
  0x7d   : > { %p2059_p1 = scmp.ne.s32.totalorder %s2801_s4, %s2058_s21  ;;  %p2065_p9 = scmp.lt.u32.totalorder %s2058_s21, %s2801_s4 }
  0x7f   : > { %p2061_p6 = pnand %p2059_p1, %p2853_p3 }
  0x81   : > { %p2062_p8 = pneg %p2061_p6 }
  0x83   : > { %p2067_p5 = pnand %p2065_p9, %p2062_p8 }
  0x85   : > { %2070 = shalt.err (!%p2067_p5)
}
  0x86   : > { %s2071_s3 = scalar_lea.vmem %s285_s26, 512  ;;  %p2079_p4 = scmp.lt.s32.totalorder %s285_s26, %s285_s26 }
  0x87   : > { %p2072_p11 = scmp.ne.s32.totalorder %s285_s26, %s2071_s3  ;;  %p2080_p10 = scmp.lt.s32.totalorder %s2071_s3, %s2071_s3 }
  0x89   : > { %p2074_p7 = pnand %p2072_p11, %p2853_p3  ;;  %p2081_p13 = por %p2080_p10, %p2079_p4 }
  0x8b   : > { %p2075_p0 = pneg %p2074_p7 }
  0x8d   : > { %p2082_p12 = pnand %p2081_p13, %p2075_p0 }
  0x8f   : > { %2085 = shalt.err (!%p2082_p12)
}
  0x90   : > { %p2854_p1 = scmp.ne.s32.totalorder %s2839_s15, 0  ;;  %s2855_s14 = smov 8  }
  0x91   : > { %s2856_s8 = smov 128   ;;  %s2086_s16 = scalar_lea.hbm %s2803_s6, 512 }
  0x92   : > { %1862 = dma.hbm_to_vmem [thread:$0]  (!%p2854_p1), %s2801_s4, 512, %s285_s26, [#allocation10], %s2856_s8, %s2856_s8, %s2855_s14  }
  0x93   : > { %p2087_p6 = scmp.ne.s32.totalorder %s2803_s6, %s2086_s16  ;;  %p2093_p9 = scmp.lt.u32.totalorder %s2086_s16, %s2803_s6 }
  0x95   : > { %p2089_p12 = pnand %p2087_p6, %p2853_p3 }
  0x97   : > { %p2090_p8 = pneg %p2089_p12 }
  0x99   : > { %p2095_p5 = pnand %p2093_p9, %p2090_p8 }
  0x9b   : > { %2098 = shalt.err (!%p2095_p5)
}
  0x9c   : > { %s2099_s7 = scalar_lea.vmem %s311_s1, 512  ;;  %p2107_p4 = scmp.lt.s32.totalorder %s311_s1, %s311_s1 }
  0x9d   : > { %p2100_p11 = scmp.ne.s32.totalorder %s311_s1, %s2099_s7  ;;  %p2108_p10 = scmp.lt.s32.totalorder %s2099_s7, %s2099_s7 }
  0x9f   : > { %p2102_p7 = pnand %p2100_p11, %p2853_p3  ;;  %p2109_p13 = por %p2108_p10, %p2107_p4 }
  0xa1   : > { %p2103_p0 = pneg %p2102_p7 }
  0xa3   : > { %p2110_p2 = pnand %p2109_p13, %p2103_p0 }
  0xa5   : > { %2113 = shalt.err (!%p2110_p2)
}
  0xa6   : > { %1868 = dma.hbm_to_vmem [thread:$0]  (!%p2854_p1), %s2803_s6, 512, %s311_s1, [#allocation13], %s2856_s8, %s2856_s8, %s2855_s14  }
  0xa7   : > { %s2580_s5 = scalar_lea.hbm %s2797_s0, %s2482_s18  ;;  %s331_s15 = scalar_lea.vmem [#allocation3], %s2486_s17 }
  0xa8   : > { %s339_s16 = sshll.u32 %s331_s15, 4  ;;  %s2589_s10 = scalar_lea.hbm %s2799_s2, %s2482_s18  ;;  %s2583_s16 = int_to_ptr.vmem [resolvable:$true] %s339_s16 }
  0xa9   : > { %s2857_s3 = sand.u32 1, %s2256_s29   ;;  %s2114_s14 = scalar_lea.hbm %s2580_s5, 128 }
  0xaa   : > { %s328_s1 = scalar_lea.sflag [#allocation4], %s2857_s3  ;;  %p2115_p2 = scmp.ne.s32.totalorder %s2580_s5, %s2114_s14 }
  0xab   : > { %p2858_p3 = scmp.ne.s32.totalorder %s2852_s9, 0  ;;  %s2119_s26 = scalar_lea.hbm %s2797_s0, 256 }
  0xac   : > { %p2120_p12 = scmp.lt.u32.totalorder %s2580_s5, %s2797_s0  ;;  %p2121_p8 = scmp.lt.u32.totalorder %s2119_s26, %s2114_s14 }
  0xad   : > { %p2117_p1 = pnand %p2115_p2, %p2858_p3  ;;  %p2123_p5 = scmp.lt.u32.totalorder %s2114_s14, %s2580_s5 }
  0xae   : > { %p2122_p9 = por %p2121_p8, %p2120_p12 }
  0xaf   : > { %p2118_p6 = pneg %p2117_p1 }
  0xb0   : > { %p2124_p11 = por %p2123_p5, %p2122_p9 }
  0xb2   : > { %p2125_p7 = pnand %p2124_p11, %p2118_p6 }
  0xb4   : > { %2128 = shalt.err (!%p2125_p7)
}
  0xb5   : > { %s2129_s18 = scalar_lea.vmem %s2583_s16, 128  ;;  %s2277_s20 = smov [#allocation3]  }
  0xb6   : > { %p2130_p0 = scmp.ne.s32.totalorder %s2583_s16, %s2129_s18  ;;  %s2134_s15 = sshll.u32 %s2277_s20, 4  ;;  %s2135_s15 = int_to_ptr.vmem [resolvable:$false] %s2134_s15 }
  0xb7   : > { %s2136_s21 = scalar_lea.vmem %s2135_s15, 256  ;;  %p2137_p13 = scmp.lt.s32.totalorder %s2583_s16, %s2135_s15 }
  0xb8   : > { %p2132_p4 = pnand %p2130_p0, %p2858_p3  ;;  %p2138_p2 = scmp.lt.s32.totalorder %s2136_s21, %s2129_s18 }
  0xba   : > { %p2133_p10 = pneg %p2132_p4  ;;  %p2139_p1 = por %p2138_p2, %p2137_p13 }
  0xbc   : > { %p2140_p12 = pnand %p2139_p1, %p2133_p10 }
  0xbe   : > { %2143 = shalt.err (!%p2140_p12)
}
  0xbf   : > { %p2859_p6 = scmp.ne.s32.totalorder %s2850_s13, 0  ;;  %s368_s19 = scalar_lea.vmem [#allocation8], %s2486_s17 }
  0xc0   : > { %s375_s3 = sshll.u32 %s368_s19, 4  ;;  %s2144_s14 = scalar_lea.hbm %s2589_s10, 128  ;;  %s376_s3 = int_to_ptr.vmem [resolvable:$true] %s375_s3 }
  0xc1   : > { %1872 = dma.hbm_to_vmem [thread:$0]  (!%p2859_p6), %s2580_s5, 128, %s2583_s16, %s328_s1  }
  0xc2   : > { %p2145_p8 = scmp.ne.s32.totalorder %s2589_s10, %s2144_s14  ;;  %s2149_s26 = scalar_lea.hbm %s2799_s2, 256 }
  0xc3   : > { %p2150_p11 = scmp.lt.u32.totalorder %s2589_s10, %s2799_s2  ;;  %p2151_p7 = scmp.lt.u32.totalorder %s2149_s26, %s2144_s14 }
  0xc4   : > { %p2147_p9 = pnand %p2145_p8, %p2858_p3  ;;  %p2153_p4 = scmp.lt.u32.totalorder %s2144_s14, %s2589_s10 }
  0xc5   : > { %p2152_p0 = por %p2151_p7, %p2150_p11 }
  0xc6   : > { %p2148_p5 = pneg %p2147_p9 }
  0xc7   : > { %p2154_p10 = por %p2153_p4, %p2152_p0 }
  0xc9   : > { %p2155_p13 = pnand %p2154_p10, %p2148_p5 }
  0xcb   : > { %2158 = shalt.err (!%p2155_p13)
}
  0xcc   : > { %s2159_s17 = scalar_lea.vmem %s376_s3, 128  ;;  %s2278_s5 = smov [#allocation8]  }
  0xcd   : > { %p2160_p2 = scmp.ne.s32.totalorder %s376_s3, %s2159_s17  ;;  %s2164_s16 = sshll.u32 %s2278_s5, 4  ;;  %s2165_s16 = int_to_ptr.vmem [resolvable:$false] %s2164_s16 }
  0xce   : > { %s2166_s1 = scalar_lea.vmem %s2165_s16, 256  ;;  %p2167_p8 = scmp.lt.s32.totalorder %s376_s3, %s2165_s16 }
  0xcf   : > { %p2162_p1 = pnand %p2160_p2, %p2858_p3  ;;  %p2168_p9 = scmp.lt.s32.totalorder %s2166_s1, %s2159_s17 }
  0xd1   : > { %p2163_p12 = pneg %p2162_p1  ;;  %p2169_p6 = por %p2168_p9, %p2167_p8 }
  0xd3   : > { %p2170_p7 = pnand %p2169_p6, %p2163_p12 }
  0xd5   : > { %2173 = shalt.err (!%p2170_p7)
}
  0xd6   : > { %p2860_p11 = scmp.ne.s32.totalorder %s2850_s13, 0  ;;  %p2861_p5 = scmp.ne.s32.totalorder %s2838_s12, 0 }
  0xd7   : > { %s2636_s9 = sand.u32 (!%p2861_p5), 1, %s2252_s28   ;;  %p2862_p3 = scmp.ne.s32.totalorder (!%p2861_p5), %s2845_s24, 0 }
  0xd8   : > { %1878 = dma.hbm_to_vmem [thread:$0]  (!%p2860_p11), %s2589_s10, 128, %s376_s3, %s2504_s22  }
  0xd9   : > { %384 = sbr.rel (%p2861_p5) target bundleno = 1779 (0x6f3), region = 52  ;;  %s2639_s18 = sshll.u32 (!%p2861_p5), %s2636_s9, 3 }
  0xda   : > { %s387_s20 = scalar_lea.sflag (!%p2861_p5), [#allocation4], %s2636_s9  ;;  %s390_s15 = scalar_lea.vmem (!%p2861_p5), [#allocation3], %s2639_s18 }
  0xe0   : > { %2227 = dma.done.wait (%p2862_p3), %s387_s20, 128  }
  0xe1   : > { %2229 = vsyncadd (%p2862_p3), %s387_s20, 4294967168  ;;  %s395_s12 = sand.u32 1, %s2365_s11   ;;  %s399_s22 = scalar_lea.vmem [#allocation6], %s2639_s18 }
  0xe2   : > { %s396_s13 = scalar_lea.sflag [#allocation7], %s395_s12 }
  0xe3   : > { %2231 = dma.done.wait (%p2862_p3), %s396_s13, 256  }
  0xe4   : > { %2233 = vsyncadd (%p2862_p3), %s396_s13, 4294967040  ;;  %s408_s10 = scalar_lea.vmem [#allocation8], %s2639_s18  ;;  %p2863_p6 = scmp.eq.s32.totalorder %s2365_s11, 0 }
  0xe6   : > { %2235 = dma.done.wait (%p2863_p6), [#allocation10], 1024   ;;  %p2864_p0 = pmov %p2863_p6 }
  0xe8   : > { %2237 = vsyncadd (%p2864_p0), [#allocation10], 4294966272  ;;  %p2865_p4 = pmov %p2864_p0 }
  0xe9   : > { %p2866_p10 = pmov %p2864_p0 }
  0xea   : > { %2239 = dma.done.wait (%p2865_p4), [#allocation13], 1024  }
  0xeb   : > { %2241 = vsyncadd (%p2866_p10), [#allocation13], 4294966272  ;;  %v2279_v0 = vmov 0.0|0.0   ;;  %vm2280_vm0 = vmmov 0   ;;  %v2281_v1 = vmov 0.0   ;;  %v470_v2 = vld [vmem:[#allocation9] sm:$0xff] }
  0xec   : > { %1808 = vmatprep.subr.bf16.mxu0 %v2279_v0  ;;  %1814 = vmatprep.subr.bf16.mxu1 %v2279_v0  ;;  %v471_v3 = vld [vmem:[#allocation9 + $0x8] sm:$0xff]  ;;  %v548_v4 = vld [vmem:[#allocation11] sm:$0xff]  ;;  %v472_v7 = vld [vmem:[#allocation9 + $0x10] sm:$0xff]  ;;  %vm474_vm1 = vcmask 261120   ;;  %vm702_vm2 = vcmask 64512   ;;  %s2282_s11 = smov 120  }
  0xed   : > { %1732 = vmatprep.mubr.msk.f32.mxu0 %vm2280_vm0, %v2281_v1  ;;  %1743 = vmatprep.mubr.msk.f32.mxu1 %vm2280_vm0, %v2281_v1  ;;  %v1809_v5 = vpack.c.bf16 %v471_v3, %v470_v2  ;;  %v549_v6 = vld [vmem:[#allocation11 + $0x8] sm:$0xff]  ;;  %v473_v8 = vld [vmem:[#allocation9 + $0x18] sm:$0xff]  ;;  %v550_v10 = vld [vmem:[#allocation11 + $0x10] sm:$0xff]  ;;  %s2283_s24 = smov 112   ;;  %s2284_s21 = smov 104   ;;  %vm1036_vm3 = vcmask 130112  }
  0xee   : > { %v1815_v9 = vpack.c.bf16 %v549_v6, %v548_v4  ;;  %v551_v11 = vld [vmem:[#allocation11 + $0x18] sm:$0xff]  ;;  %v1812_v12 = vpack.c.bf16 %v473_v8, %v472_v7  ;;  %v468_v15 = vld [vmem:[%s399_s22] sm:$0xff]  ;;  %v627_v18 = vld [vmem:[#allocation12 + $0x10] sm:$0xff]  ;;  %s2285_s19 = smov 8   ;;  %s2286_s3 = smov 16   ;;  %vm1208_vm4 = vcmask 195712  }
  0xef   : > { %1810 = vmatpush3.bf16.msra.mxu0 %v1809_v5  ;;  %v1818_v13 = vpack.c.bf16 %v551_v11, %v550_v10  ;;  %v467_v14 = vld [vmem:[%s390_s15] sm:$0xff]  ;;  %v625_v16 = vld [vmem:[#allocation12] sm:$0xff]  ;;  %v626_v17 = vld [vmem:[#allocation12 + $0x8] sm:$0xff]  ;;  %s2287_s14 = smov 24   ;;  %vm1380_vm5 = vcmask 261312   ;;  %s2867_s26 = sld [smem:[#allocation30_spill]] }
  0xf0   : > { %1816 = vmatpush3.bf16.msra.mxu1 %v1815_v9  ;;  %1811 = vmatprep.subr.bf16.mxu0 %v2279_v0  ;;  %v1821_v19 = vpack.c.bf16 %v626_v17, %v625_v16  ;;  %v628_v20 = vld [vmem:[#allocation12 + $0x18] sm:$0xff]  ;;  %v1383_v16 = vld [vmem:[#allocation14] sm:$0xff]  ;;  %v1384_v17 = vld [vmem:[#allocation14 + $0x8] sm:$0xff]  ;;  %s1685_s27 = sshll.u32 %s2260_s30, 7  ;;  %s466_s23 = scalar_lea.vmem [#allocation15], %s2639_s18 }
  0xf1   : > { %1817 = vmatprep.subr.bf16.mxu1 %v2279_v0  ;;  %v1824_v21 = vpack.c.bf16 %v628_v20, %v627_v18  ;;  %v469_v22 = vld [vmem:[%s408_s10] sm:$0xff]  ;;  %s1483_s17 = sshll.u32 %s466_s23, 4  ;;  %s2868_s1 = sld [smem:[#allocation31_spill]]  ;;  %s2749_s17 = int_to_ptr.vmem [resolvable:$true] %s1483_s17 }
  0xf2   : > { %v1385_v18 = vld [vmem:[#allocation14 + $0x10] sm:$0xff]  ;;  %s1469_s15 = scalar_lea.sflag [#allocation5], %s2636_s9  ;;  %s2174_s12 = scalar_lea.vmem %s2749_s17, 128 }
  0xf3   : > { %1813 = vmatpush3.bf16.msra.mxu0 %v1812_v12  ;;  %p2175_p13 = scmp.ne.s32.totalorder %s2749_s17, %s2174_s12  ;;  %p2869_p2 = scmp.ne.s32.totalorder %s2846_s25, 0 }
  0xf4   : > { %1819 = vmatpush3.bf16.msra.mxu1 %v1818_v13  ;;  %1820 = vmatprep.subr.bf16.mxu0 %v2279_v0  ;;  %s2288_s30 = smov [#allocation15]  }
  0xf5   : > { %1757 = vmatprep.subr.mxu1 %v2281_v1  ;;  %p2176_p1 = pnand %p2175_p13, %p2869_p2  ;;  %s2178_s18 = sshll.u32 %s2288_s30, 4  ;;  %s2179_s18 = int_to_ptr.vmem [resolvable:$false] %s2178_s18 }
  0xf6   : > { %1733 = vmatmul.mubr.msk.f32.vlgmr.msra.gmra.mrb[0].mxu0 %vm474_vm1, %v467_v14  ;;  %s2180_s13 = scalar_lea.vmem %s2179_s18, 256  ;;  %p2181_p8 = scmp.lt.s32.totalorder %s2749_s17, %s2179_s18 }
  0xf7   : > { %1744 = vmatmul.mubr.msk.f32.vlgmr.msra.gmra.mrb[0].mxu1 %vm474_vm1, %v468_v15  ;;  %1754 = vmatprep.mubr.msk.f32.mxu0 %vm2280_vm0, %v2281_v1  ;;  %s2747_s20 = scalar_lea.hbm %s2868_s1, %s1685_s27  ;;  %p2177_p12 = pneg %p2176_p1 }
  0xf8   : > { %1759 = vmatprep.mubr.msk.f32.mxu1 %vm2280_vm0, %v2281_v1  ;;  %1822 = vmatpush3.bf16.msra.mxu0 %v1821_v19  ;;  %v1386_v19 = vld [vmem:[#allocation14 + $0x18] sm:$0xff]  ;;  %p2182_p9 = scmp.lt.s32.totalorder %s2180_s13, %s2174_s12 }
  0xf9   : > { %1823 = vmatprep.subr.bf16.mxu0 %v2279_v0 }
  0xfa   : > { %p2183_p7 = por %p2182_p9, %p2181_p8 }
  0xfc   : > { %1825 = vmatpush3.bf16.msra.mxu0 %v1824_v21  ;;  %p2184_p11 = pnand %p2183_p7, %p2177_p12 }
  0xfd   : > { %1777 = vmatprep.subr.mxu0 %v2281_v1 }
  0xff   : > { %1755 = vmatmul.mubr.msk.f32.vlgmr.msra.gmra.mrb[2].mxu0 %vm474_vm1, %v469_v22  ;;  %v1830_v22 = vpack.c.bf16 %v1386_v19, %v1385_v18 }
 0x100   : > { %1779 = vmatprep.mubr.msk.f32.mxu0 %vm2280_vm0, %v2281_v1 }
 0x1c9   : > { %v544_v23 = vpop.f32.mrb[0].mxu0 }
 0x1ca   : > { %v621_v24 = vpop.f32.mrb[0].mxu1  ;;  %865 = vrot.lane.b32.xlu1 %v544_v23, %s2282_s11  ;;  %v1734_v25 = vpop.f32.mrb[1].mxu0 }
 0x1cb   : > { %v1745_v26 = vpop.f32.mrb[1].mxu1  ;;  %1758 = vmatpush3.xpose.msk.msra.mxu1 %vm702_vm2, %v621_v24 }
 0x1cc   : > { %1762 = vmatprep.subr.mxu1 %v2281_v1 }
 0x1ce   : > { %1760 = vmatmul.mubr.msk.f32.vlgmr.msra.gmra.mrb[2].mxu1 %vm702_vm2, %v544_v23  ;;  %1040 = vrot.lane.b32.xlu1 %v621_v24, %s2283_s24 }
 0x1cf   : > { %1764 = vmatprep.mubr.msk.f32.mxu1 %vm2280_vm0, %v2281_v1 }
 0x1d2   : > { %1038 = vrot.lane.b32.xlu1 %v544_v23, %s2283_s24  ;;  %v698_v27 = vpop.f32.mrb[2].mxu0 }
 0x1d3   : > { %v1756_v28 = vpop.f32.mrb[3].mxu0  ;;  %1763 = vmatpush3.msra.mxu1 %v698_v27 }
 0x1d4   : > { %1767 = vmatprep.subr.mxu1 %v2281_v1 }
 0x1d6   : > { %1212 = vrot.lane.b32.xlu1 %v621_v24, %s2284_s21 }
 0x1da   : > { %1210 = vrot.lane.b32.xlu1 %v544_v23, %s2284_s21 }
 0x1de   : > { %1125 = vrot.lane.b32.xlu1 %v698_v27, %s2283_s24 }
 0x23c   : > { %v866_v29 = vpop.permute.xlu1 %865 }
 0x240   : > { %v1041_v30 = vpop.permute.xlu1 %1040 }
 0x241   : > { %1778 = vmatpush3.xpose.msk.msra.mxu0 %vm702_vm2, %v1041_v30 }
 0x242   : > { %1787 = vmatprep.subr.mxu0 %v2281_v1 }
 0x244   : > { %v1039_v31 = vpop.permute.xlu1 %1038 }
 0x245   : > { %1780 = vmatmul.mubr.msk.f32.vlgmr.msra.gmra.mrb[4].mxu0 %vm702_vm2, %v1039_v31 }
 0x246   : > { %1789 = vmatprep.mubr.msk.f32.mxu0 %vm2280_vm0, %v2281_v1 }
 0x248   : > { %v1213_v32 = vpop.permute.xlu1 %1212 }
 0x249   : > { %1788 = vmatpush3.xpose.msk.msra.mxu0 %vm702_vm2, %v1213_v32 }
 0x24a   : > { %1826 = vmatprep.subr.bf16.mxu0 %v2279_v0 }
 0x24c   : > { %v1211_v33 = vpop.permute.xlu1 %1210 }
 0x24d   : > { %1790 = vmatmul.mubr.msk.f32.vlgmr.msra.gmra.mrb[6].mxu0 %vm702_vm2, %v1211_v33 }
 0x24e   : > { %1805 = vmatprep.mubr.msk.f32.mxu0 %vm2280_vm0, %v2281_v1 }
 0x250   : > { %v1126_v59 = vpop.permute.xlu1 %1125 }
 0x2a1   : > { %v775_v34 = vpop.f32.mrb[2].mxu1 }
 0x2a2   : > { %v1761_v35 = vpop.f32.mrb[3].mxu1  ;;  %v779_v36 = vsel %vm702_vm2, %v775_v34, -inf }
 0x2a3   : > { %780 = vmax.xlane.f32.xlu0 %v779_v36  ;;  %v1682_v36 = vld [vmem:[%s2867_s26] ss:$0 sm:$0xff] }
 0x2b9   : > { %867 = vrot.lane.b32.xlu0 %v621_v24, %s2282_s11 }
 0x318   : > { %v1112_v37 = vpop.f32.mrb[4].mxu0 }
 0x319   : > { %v1781_v38 = vpop.f32.mrb[5].mxu0  ;;  %v1116_v39 = vsel %vm702_vm2, %v1112_v37, -inf }
 0x31a   : > { %1117 = vmax.xlane.f32.xlu0 %v1116_v39 }
 0x320   : > { %v1284_v40 = vpop.f32.mrb[6].mxu0 }
 0x321   : > { %v1791_v41 = vpop.f32.mrb[7].mxu0  ;;  %v1288_v42 = vsel %vm702_vm2, %v1284_v40, -inf }
 0x322   : > { %1289 = vmax.xlane.f32.xlu1 %v1288_v42 }
 0x330   : > { %v781_v43 = vpop.xlane.xlu0 %780  ;;  %953 = vrot.lane.b32.xlu0 %v698_v27, %s2282_s11 }
 0x331   : > { %v782_v44 = vsub.f32 %v775_v34, %v781_v43 }
 0x333   : > { %v783_v45 = vmul.f32 1.442695, %v782_v44 }
 0x334   : > { %v868_v47 = vpop.permute.xlu0 %867 }
 0x335   : > { %1956 = vpow2.f32 %v783_v45 }
 0x33f   : > { %v1957_v46 = vpop.eup %1956 }
 0x340   : > { %1765 = vmatmul.mubr.msk.f32.vlgmr.msra.gmra.mrb[4].mxu1 %vm702_vm2, %v1957_v46  ;;  %v785_v9 = vsel %vm702_vm2, %v1957_v46, 0.0 }
 0x341   : > { %1768 = vmatpush3.xpose.msk.msra.mxu1 %vm702_vm2, %v868_v47  ;;  %1769 = vmatprep.mubr.msk.f32.mxu1 %vm2280_vm0, %v2281_v1 }
 0x342   : > { %1772 = vmatprep.subr.mxu1 %v2281_v1 }
 0x344   : > { %1770 = vmatmul.mubr.msk.f32.vlgmr.msra.gmra.mrb[6].mxu1 %vm702_vm2, %v866_v29 }
 0x345   : > { %1774 = vmatprep.mubr.msk.f32.mxu1 %vm2280_vm0, %v2281_v1 }
 0x3a7   : > { %v1118_v48 = vpop.xlane.xlu0 %1117 }
 0x3a8   : > { %v1119_v49 = vsub.f32 %v1112_v37, %v1118_v48 }
 0x3aa   : > { %v1120_v56 = vmul.f32 1.442695, %v1119_v49 }
 0x3ab   : > { %v954_v50 = vpop.permute.xlu0 %953 }
 0x3ac   : > { %1773 = vmatpush3.msra.mxu1 %v954_v50  ;;  %1958 = vpow2.f32 %v1120_v56 }
 0x3ad   : > { %1782 = vmatprep.subr.mxu1 %v2281_v1 }
 0x3af   : > { %v1290_v60 = vpop.xlane.xlu1 %1289 }
 0x3b0   : > { %v1291_v61 = vsub.f32 %v1284_v40, %v1290_v60 }
 0x3b2   : > { %v1292_v2 = vmul.f32 1.442695, %v1291_v61 }
 0x3b6   : > { %v1959_v57 = vpop.eup %1958 }
 0x3b7   : > { %v1122_v58 = vsel %vm702_vm2, %v1959_v57, 0.0 }
 0x413   : > { %v857_v51 = vpop.f32.mrb[4].mxu1 }
 0x414   : > { %v1766_v52 = vpop.f32.mrb[5].mxu1 }
 0x417   : > { %v939_v53 = vpop.f32.mrb[6].mxu1 }
 0x418   : > { %v1771_v54 = vpop.f32.mrb[7].mxu1  ;;  %v943_v55 = vsel %vm702_vm2, %v939_v53, -inf }
 0x419   : > { %944 = vmax.xlane.f32.xlu1 %v943_v55 }
 0x42a   : > { %1297 = vrot.lane.b32.xlu1 %v698_v27, %s2284_s21 }
 0x44e   : > { %1123 = vadd.xlane.f32.xlu1 %v1122_v58 }
 0x4a6   : > { %v945_v62 = vpop.xlane.xlu1 %944 }
 0x4a7   : > { %v946_v63 = vsub.f32 %v939_v53, %v945_v62 }
 0x4a9   : > { %v947_v3 = vmul.f32 1.442695, %v946_v63 }
 0x4aa   : > { %v1298_v7 = vpop.permute.xlu1 %1297 }
 0x4ab   : > { %1960 = vpow2.f32 %v947_v3 }
 0x4ac   : > { %1962 = vpow2.f32 %v1292_v2 }
 0x4b5   : > { %v1961_v4 = vpop.eup %1960 }
 0x4b6   : > { %1775 = vmatmul.mubr.msk.f32.vlgmr.msra.gmra.mrb[8].mxu1 %vm702_vm2, %v1961_v4  ;;  %v949_v5 = vsel %vm702_vm2, %v1961_v4, 0.0  ;;  %v1963_v6 = vpop.eup %1962 }
 0x4b7   : > { %1783 = vmatpush3.msra.mxu1 %v1126_v59  ;;  %950 = vadd.xlane.f32.xlu0 %v949_v5  ;;  %v1294_v8 = vsel %vm702_vm2, %v1963_v6, 0.0 }
 0x4b8   : > { %1784 = vmatprep.mubr.msk.f32.mxu1 %vm2280_vm0, %v2281_v1  ;;  %1792 = vmatprep.subr.mxu1 %v2281_v1 }
 0x4ba   : > { %1785 = vmatmul.mubr.msk.f32.vlgmr.msra.gmra.mrb[10].mxu1 %vm702_vm2, %v1959_v57 }
 0x4bb   : > { %1793 = vmatpush3.msra.mxu1 %v1298_v7  ;;  %1295 = vadd.xlane.f32.xlu0 %v1294_v8 }
 0x4bc   : > { %1794 = vmatprep.mubr.msk.f32.mxu1 %vm2280_vm0, %v2281_v1  ;;  %v1827_v1 = vpack.c.bf16 %v1384_v17, %v1383_v16 }
 0x4be   : > { %1795 = vmatmul.mubr.msk.f32.vlgmr.msra.gmra.mrb[12].mxu1 %vm702_vm2, %v1963_v6  ;;  %1828 = vmatpush3.bf16.msra.mxu0 %v1827_v1 }
 0x4bf   : > { %786 = vadd.xlane.f32.xlu0 %v785_v9  ;;  %1829 = vmatprep.subr.bf16.mxu0 %v2279_v0 }
 0x4c2   : > { %1831 = vmatpush3.bf16.msra.mxu0 %v1830_v22 }
 0x4db   : > { %v1124_v15 = vpop.xlane.xlu1 %1123 }
 0x544   : > { %v951_v10 = vpop.xlane.xlu0 %950 }
 0x548   : > { %v1296_v11 = vpop.xlane.xlu0 %1295 }
 0x54c   : > { %v787_v12 = vpop.xlane.xlu0 %786 }
 0x54d   : > { %1964 = vrcp.f32 %v787_v12 }
 0x54e   : > { %1966 = vrcp.f32 %v951_v10 }
 0x54f   : > { %1968 = vrcp.f32 %v1124_v15 }
 0x550   : > { %1970 = vrcp.f32 %v1296_v11 }
 0x557   : > { %v1965_v13 = vpop.eup %1964 }
 0x558   : > { %v863_v14 = vmul.f32 %v1965_v13, %v857_v51  ;;  %v1967_v20 = vpop.eup %1966 }
 0x559   : > { %v1969_v25 = vpop.eup %1968 }
 0x55a   : > { %864 = vst.msk [vmem:[#allocation2] sm:$0xff] %vm702_vm2, %v863_v14  ;;  %v1971_v29 = vpop.eup %1970 }
 0x589   : > { %v1025_v21 = vpop.f32.mrb[8].mxu1 }
 0x58a   : > { %v1031_v23 = vmul.f32 %v1967_v20, %v1025_v21  ;;  %v1776_v24 = vpop.f32.mrb[9].mxu1 }
 0x58c   : > { %1033 = vrot.lane.b32.xlu1 %v1031_v23, %s2285_s19 }
 0x58d   : > { %v1197_v26 = vpop.f32.mrb[10].mxu1 }
 0x58e   : > { %v1203_v27 = vmul.f32 %v1969_v25, %v1197_v26  ;;  %v1786_v28 = vpop.f32.mrb[11].mxu1 }
 0x590   : > { %1205 = vrot.lane.b32.xlu0 %v1203_v27, %s2286_s3 }
 0x591   : > { %v1369_v30 = vpop.f32.mrb[12].mxu1 }
 0x592   : > { %v1375_v31 = vmul.f32 %v1971_v29, %v1369_v30  ;;  %v1796_v32 = vpop.f32.mrb[13].mxu1 }
 0x594   : > { %1377 = vrot.lane.b32.xlu1 %v1375_v31, %s2287_s14 }
 0x5fe   : > { %v1034_v33 = vpop.permute.xlu1 %1033 }
 0x5ff   : > { %1037 = vst.msk [vmem:[#allocation2] sm:$0xff] %vm1036_vm3, %v1034_v33 }
 0x602   : > { %v1206_v0 = vpop.permute.xlu0 %1205 }
 0x603   : > { %1209 = vst.msk [vmem:[#allocation2] sm:$0xff] %vm1208_vm4, %v1206_v0 }
 0x606   : > { %v1378_v34 = vpop.permute.xlu1 %1377 }
 0x607   : > { %1381 = vst.msk [vmem:[#allocation2] sm:$0xff] %vm1380_vm5, %v1378_v34 }
 0x60e   : > { %v1382_v35 = vld [vmem:[#allocation2] sm:$0xff] }
 0x60f   : > { %1806 = vmatmul.mubr.msk.f32.vlgmr.msra.gmra.mrb[8].mxu0 %vm474_vm1, %v1382_v35 }
 0x6e2   : > { %v1463_v37 = vpop.f32.mrb[8].mxu0 }
 0x6e3   : > { %v1464_v38 = vadd.f32 %v1682_v36, %v1463_v37  ;;  %v1807_v39 = vpop.f32.mrb[9].mxu0 }
 0x6e5   : > { %1467 = vst.msk [vmem:[%s466_s23] sm:$0xff] %vm474_vm1, %v1464_v38 }
 0x6e6   : > { %2187 = shalt.err (!%p2184_p11)
}
 0x6e7   : > { %s2188_s9 = scalar_lea.hbm %s2747_s20, 128  ;;  %s2192_s11 = scalar_lea.hbm %s2868_s1, 256 }
 0x6e8   : > { %p2189_p5 = scmp.ne.s32.totalorder %s2747_s20, %s2188_s9  ;;  %p2193_p0 = scmp.lt.u32.totalorder %s2747_s20, %s2868_s1 }
 0x6e9   : > { %p2194_p4 = scmp.lt.u32.totalorder %s2192_s11, %s2188_s9  ;;  %p2196_p13 = scmp.lt.u32.totalorder %s2188_s9, %s2747_s20 }
 0x6ea   : > { %p2190_p3 = pnand %p2189_p5, %p2869_p2 }
 0x6eb   : > { %p2195_p10 = por %p2194_p4, %p2193_p0 }
 0x6ec   : > { %p2191_p6 = pneg %p2190_p3 }
 0x6ed   : > { %p2197_p1 = por %p2196_p13, %p2195_p10 }
 0x6ef   : > { %p2198_p12 = pnand %p2197_p1, %p2191_p6 }
 0x6f1   : > { %2201 = shalt.err (!%p2198_p12)
}
 0x6f2   : > { %1854 = dma.vmem_to_hbm [thread:$0]  (%p2869_p2), %s2749_s17, 128, %s2747_s20, %s1469_s15  }
 0x6f3 PF: > { %s2870_s19 = sld [smem:[#allocation21_spill]]  ;;  %s2871_s3 = sld [smem:[#allocation26_spill]] }
 0x6f4   : > { %s2872_s14 = sld [smem:[#allocation23_spill]] }
 0x6f9   : > { %s1495_s8 = sand.u32 1, %s2870_s19   ;;  %p2873_p8 = scmp.ne.s32.totalorder %s2871_s3, 0 }
 0x6fa   : > { %p2874_p9 = scmp.ge.s32.totalorder %s2872_s14, 2  ;;  %s1496_s7 = scalar_lea.sflag [#allocation5], %s1495_s8 }
 0x6fc   : > { %p1880_p7 = pnand %p2874_p9, %p2873_p8 }
 0x6fe   : > { %2243 = dma.done.wait (!%p1880_p7), %s1496_s7, 128  }
 0x6ff   : > { %2245 = vsyncadd (!%p1880_p7), %s1496_s7, 4294967168  ;;  %s29_s10 = sadd.s32 1, %s2872_s14   ;;  %s2875_s25 = sld [smem:[#allocation25_spill]] }
 0x700   : > { %p26_p11 = scmp.ge.s32.totalorder %s29_s10, 4   ;;  %s2876_s30 = sld [smem:[#allocation22_spill]] }
 0x701   : > { %s2877_s9 = sld [smem:[#allocation24_spill]]  ;;  %s2878_s27 = smov %s2252_s28 }
 0x702   : > { %s2879_s28 = smov %s2256_s29  ;;  %28 = sbr.rel (!%p26_p11) target bundleno = 16 (0x10), region = 137 }
 0x705   : > { %s2880_s29 = smov %s2875_s25 }
 0x709   :  { %1501 = vsyncpa [#allocation4], 1 }
 0x70a   :  { %1503 = vsyncpa [#allocation4 + $0x1], 1 }
 0x70b   :  { %1504 = vsyncpa [#allocation7], 1 }
 0x70c   :  { %1506 = vsyncpa [#allocation7 + $0x1], 1 }
 0x70d   :  { %1507 = vsyncpa [#allocation10], 1 }
 0x70e   :  { %1508 = vsyncpa [#allocation13], 1 }
 0x70f   :  { %1509 = vsyncpa [#allocation5], 1 }
 0x710   :  { %1511 = vsyncpa [#allocation5 + $0x1], 1 }

</bundles_post_ra>
